<compile_context>
chip_gen: v5e
topology: v5e:2x2
jax: 0.10.0
libtpu: 0.0.40
codegen_flags: <defaults>
</compile_context>

<pallas_src>
import math
from functools import partial

import jax
import jax.numpy as jnp
from jax import lax
from jax.experimental import pallas as pl
from jax.experimental.pallas import tpu as pltpu


_INV_SQRT2 = 1.0 / math.sqrt(2.0)
_TANH_C = math.sqrt(2.0 / math.pi)


def _round_up(n, m):
    return ((n + m - 1) // m) * m


def _cdiv(a, b):
    return (a + b - 1) // b


def _erf_via_exp(x):
    # Abramowitz & Stegun 7.1.26 rational approximation of erf (max abs error
    # ~1.5e-7).  Uses only exp / mul / add / div, all guaranteed to lower in
    # Mosaic (exp goes to the EUP slot).  Matches exact erf to ~1e-7, so the
    # exact-GELU path matches PyTorch's nn.GELU() default for all practical
    # purposes.
    a1, a2, a3, a4, a5 = (0.254829592, -0.284496736, 1.421413741,
                          -1.453152027, 1.061405429)
    p = 0.3275911
    z = jnp.abs(x)
    t = 1.0 / (1.0 + p * z)
    poly = ((((a5 * t + a4) * t + a3) * t + a2) * t + a1) * t
    r = 1.0 - poly * jnp.exp(-z * z)
    return jnp.where(x < 0.0, -r, r)


def _gelu(x, approximate):
    if approximate:
        # tanh-approx GELU: the transcendental goes to the EUP slot, freeing
        # the VALU slot (matters on v7x / once bf16 I/O removes the HBM
        # bottleneck).  ~1e-3 deviation from exact GELU.
        return 0.5 * x * (1.0 + jnp.tanh(_TANH_C * (x + 0.044715 * x * x * x)))
    # Exact-erf GELU (PyTorch nn.GELU() default).
    return 0.5 * x * (1.0 + _erf_via_exp(x * _INV_SQRT2))


def embedding_kernel(x_ref, w1_ref, b1_ref, w2_ref, b2_ref, o_ref, *,
                     approximate_gelu):
    # x_ref: (TM, D_in) row tile of the flattened (B*S, D_in) input.
    # Eval-mode BatchNorm1d is already folded into (w1_ref, b1_ref).
    w1 = w1_ref[...]
    w2 = w2_ref[...]
    x = x_ref[...].astype(w1.dtype)

    # Linear 1 (+ folded BN) + GELU   (MXU matmul, f32 accumulation)
    # TODO(synk): pass precision=lax.Precision.HIGHEST here (and in the
    # reference) if bit-level parity with PyTorch f32 nn.Linear is required.
    h = jnp.dot(x, w1, preferred_element_type=jnp.float32) + b1_ref[...]
    h = _gelu(h, approximate_gelu)

    # Linear 2 + GELU
    h = jnp.dot(h.astype(w2.dtype), w2,
                preferred_element_type=jnp.float32) + b2_ref[...]
    h = _gelu(h, approximate_gelu)

    o_ref[...] = h.astype(o_ref.dtype)


def embedding_forward(x, bn_scale, bn_shift, w1, b1, w2, b2, *, tm=4096,
                      out_dtype=None, compute_dtype=None,
                      approximate_gelu=False):
    """x: (B, S, D_in) -> (B, S, H2).

    bn_scale / bn_shift are the eval-mode BatchNorm1d per-feature affine
    (gamma/sqrt(var+eps), beta - mean*scale), folded into Linear1 on the host.

    out_dtype:      output dtype (default x.dtype; bf16 halves output HBM traffic).
    compute_dtype:  MXU operand dtype for x/W (default f32; bf16 gives 2-4x
                    MXU throughput with f32 accumulation).
    approximate_gelu: tanh-approx GELU (EUP) instead of exact erf GELU.
    """
    B, S, D_in = x.shape
    H1 = w1.shape[1]
    H2 = w2.shape[1]
    N = B * S

    out_dtype = x.dtype if out_dtype is None else out_dtype
    compute_dtype = jnp.float32 if compute_dtype is None else compute_dtype

    # --- Host-side fold of eval-mode BatchNorm into the first Linear -------
    w1_f32 = w1.astype(jnp.float32)
    w1f = (bn_scale.astype(jnp.float32)[:, None] * w1_f32).astype(compute_dtype)
    b1f = (bn_shift.astype(jnp.float32) @ w1_f32
           + b1.astype(jnp.float32)).reshape(1, H1)          # f32 (1, H1)
    w2c = w2.astype(compute_dtype)
    b2c = b2.astype(jnp.float32).reshape(1, H2)               # f32 (1, H2)

    # --- Row tiling ---------------------------------------------------------
    # Big tiles amortize the ~0.35 us per-step overhead, but on large problems
    # keep >= ~8 grid steps so v7x's 2 TensorCores each see a pipelined slice.
    n8 = _round_up(max(N, 1), 8)
    tm_eff = max(8, min(tm, n8))
    steps_target = _round_up(_cdiv(n8, 8), 8)     # tile giving ~8 grid steps
    if steps_target >= 512:                       # only cap when tiles stay big
        tm_eff = min(tm_eff, steps_target)
    tm_eff = _round_up(tm_eff, 8)

    x2 = x.reshape(N, D_in)                       # free reshape (merge leading dims)
    grid = (_cdiv(N, tm_eff),)                    # partial last block handled by Pallas

    # --- VMEM budget: double-buffered x/out tiles + f32 intermediates ------
    itm = jnp.dtype(x2.dtype).itemsize
    oitm = jnp.dtype(out_dtype).itemsize
    witm = jnp.dtype(compute_dtype).itemsize
    est = (2 * tm_eff * (D_in * itm + H2 * oitm)           # in/out, double-buffered
           + tm_eff * (H1 + H2) * 4                        # f32 intermediates
           + 2 * (D_in * H1 + H1 * H2) * witm + (H1 + H2) * 8
           + (2 << 20))                                     # slack
    vmem_limit = int(min(max(est, 32 << 20), 64 << 20))

    kernel = partial(embedding_kernel, approximate_gelu=approximate_gelu)

    out2 = pl.pallas_call(
        kernel,
        out_shape=jax.ShapeDtypeStruct((N, H2), out_dtype),
        grid_spec=pltpu.PrefetchScalarGridSpec(
            num_scalar_prefetch=0,
            grid=grid,
            in_specs=[
                pl.BlockSpec((tm_eff, D_in), lambda i: (i, 0)),   # x row tile
                pl.BlockSpec((D_in, H1), lambda i: (0, 0)),       # W1 (BN folded)
                pl.BlockSpec((1, H1), lambda i: (0, 0)),          # b1 (BN folded, f32)
                pl.BlockSpec((H1, H2), lambda i: (0, 0)),         # W2
                pl.BlockSpec((1, H2), lambda i: (0, 0)),          # b2 (f32)
            ],
            out_specs=pl.BlockSpec((tm_eff, H2), lambda i: (i, 0)),
        ),
        compiler_params=pltpu.CompilerParams(
            dimension_semantics=("parallel",),
            vmem_limit_bytes=vmem_limit),
    )(x2, w1f, b1f, w2c, b2c)

    return out2.reshape(B, S, H2)


def _reference(x, bn_scale, bn_shift, w1, b1, w2, b2):
    # Pure-JAX reference (exact-erf GELU, same math as the PyTorch module).
    h = x.astype(jnp.float32) * bn_scale[None, None, :] + bn_shift[None, None, :]
    h = h @ w1 + b1[None, None, :]
    h = 0.5 * h * (1.0 + lax.erf(h * _INV_SQRT2))
    h = h @ w2 + b2[None, None, :]
    h = 0.5 * h * (1.0 + lax.erf(h * _INV_SQRT2))
    return h


if __name__ == "__main__":
    # Small shapes consistent with the module: input_dim=32, embed_dims=(64, 128).
    D_in, H1, H2 = 32, 64, 128

    key = jax.random.PRNGKey(0)
    kx, km, kv, kg, kb, kw1, kb1, kw2, kb2, kx2 = jax.random.split(key, 10)

    # Deterministic eval-mode BatchNorm1d parameters (running stats).
    eps = 1e-5
    running_mean = 0.1 * jax.random.normal(km, (D_in,), dtype=jnp.float32)
    running_var = 1.0 + 0.1 * jax.random.uniform(kv, (D_in,), dtype=jnp.float32)
    gamma = 1.0 + 0.05 * jax.random.normal(kg, (D_in,), dtype=jnp.float32)
    beta = 0.05 * jax.random.normal(kb, (D_in,), dtype=jnp.float32)
    bn_scale = gamma / jnp.sqrt(running_var + eps)
    bn_shift = beta - running_mean * bn_scale

    # Deterministic Linear parameters (stored (in, out) for row-major matmul).
    w1 = jax.random.normal(kw1, (D_in, H1), dtype=jnp.float32) / math.sqrt(D_in)
    b1 = 0.01 * jax.random.normal(kb1, (H1,), dtype=jnp.float32)
    w2 = jax.random.normal(kw2, (H1, H2), dtype=jnp.float32) / math.sqrt(H1)
    b2 = 0.01 * jax.random.normal(kb2, (H2,), dtype=jnp.float32)

    # Tolerance note: the in-kernel (Mosaic) and XLA-reference f32 matmuls may
    # use different default MXU pass counts (bf16 passes), so the comparison
    # tolerance covers ~1e-2 worst-case rounding differences; structural bugs
    # (wrong BN fold / GELU / tiling) produce errors orders of magnitude larger.

    # Case 1: f32 end-to-end, default tile (clamped to the tiny problem).
    B, S = 2, 8
    x = jax.random.normal(kx, (B, S, D_in), dtype=jnp.float32)
    out = embedding_forward(x, bn_scale, bn_shift, w1, b1, w2, b2)
    out = jax.block_until_ready(out)
    ref = _reference(x, bn_scale, bn_shift, w1, b1, w2, b2)
    assert out.shape == (B, S, H2)
    assert jnp.allclose(out, ref, atol=5e-2, rtol=5e-2), "mismatch (case 1)"

    # Case 2: ragged row count (21 rows) + small tile -> multi-step grid with
    # a partial final block handled by Pallas (no host-side pad / slice).
    B2, S2 = 3, 7
    x_b = jax.random.normal(kx2, (B2, S2, D_in), dtype=jnp.float32)
    out_b = embedding_forward(x_b, bn_scale, bn_shift, w1, b1, w2, b2, tm=8)
    out_b = jax.block_until_ready(out_b)
    ref_b = _reference(x_b, bn_scale, bn_shift, w1, b1, w2, b2)
    assert out_b.shape == (B2, S2, H2)
    assert jnp.allclose(out_b, ref_b, atol=5e-2, rtol=5e-2), "mismatch (case 2)"

    # Case 3: bf16 I/O + bf16 MXU operands + tanh-approx GELU (the low-HBM /
    # high-MXU-throughput path from the perf review).  Looser tolerance for
    # bf16 quantization and the tanh approximation.
    x_c = x_b.astype(jnp.bfloat16)
    out_c = embedding_forward(x_c, bn_scale, bn_shift, w1, b1, w2, b2, tm=8,
                              compute_dtype=jnp.bfloat16,
                              out_dtype=jnp.bfloat16,
                              approximate_gelu=True)
    out_c = jax.block_until_ready(out_c)
    assert out_c.shape == (B2, S2, H2)
    assert out_c.dtype == jnp.bfloat16
    assert jnp.allclose(out_c.astype(jnp.float32), ref_b, atol=2e-1, rtol=2e-1), \
        "mismatch (case 3)"

    print("KERNEL_OK")
</pallas_src>

<mosaic_0001>
module attributes {stable_mosaic.version = 11 : i64} {
  func.func @embedding_kernel(%arg0: i32, %arg1: memref<16x32xf32, #tpu.memory_space<vmem>>, %arg2: memref<32x64xf32, #tpu.memory_space<vmem>>, %arg3: memref<1x64xf32, #tpu.memory_space<vmem>>, %arg4: memref<64x128xf32, #tpu.memory_space<vmem>>, %arg5: memref<1x128xf32, #tpu.memory_space<vmem>>, %arg6: memref<16x128xf32, #tpu.memory_space<vmem>>) attributes {dimension_semantics = [#tpu.dimension_semantics<parallel>], iteration_bounds = array<i64: 1>, scalar_prefetch = 0 : i64, scratch_operands = 0 : i64, tpu.core_type = #tpu.core_type<tc>, window_params = [{transform_indices = @transform_0, window_bounds = array<i64: 16, 32>}, {pipeline_mode = #tpu.pipeline_mode<synchronous>, transform_indices = @transform_1, window_bounds = array<i64: 32, 64>}, {pipeline_mode = #tpu.pipeline_mode<synchronous>, transform_indices = @transform_2, window_bounds = array<i64: 1, 64>}, {pipeline_mode = #tpu.pipeline_mode<synchronous>, transform_indices = @transform_3, window_bounds = array<i64: 64, 128>}, {pipeline_mode = #tpu.pipeline_mode<synchronous>, transform_indices = @transform_4, window_bounds = array<i64: 1, 128>}, {transform_indices = @transform_5, window_bounds = array<i64: 16, 128>}]} {
    %c0 = arith.constant 0 : index
    %c0_0 = arith.constant 0 : index
    %0 = vector.load %arg2[%c0, %c0_0] : memref<32x64xf32, #tpu.memory_space<vmem>>, vector<32x64xf32>
    %c0_1 = arith.constant 0 : index
    %c0_2 = arith.constant 0 : index
    %1 = vector.load %arg4[%c0_1, %c0_2] : memref<64x128xf32, #tpu.memory_space<vmem>>, vector<64x128xf32>
    %c0_3 = arith.constant 0 : index
    %c0_4 = arith.constant 0 : index
    %2 = vector.load %arg1[%c0_3, %c0_4] : memref<16x32xf32, #tpu.memory_space<vmem>>, vector<16x32xf32>
    %cst = arith.constant dense<0.000000e+00> : vector<16x64xf32>
    %3 = tpu.matmul %2, %0, %cst {dimension_numbers = #tpu.dot_dimension_numbers<[1], [0], [0], [1], [0, 0, 1, 1], [], []>} : vector<16x32xf32>, vector<32x64xf32>, vector<16x64xf32> -> vector<16x64xf32>
    %c0_5 = arith.constant 0 : index
    %c0_6 = arith.constant 0 : index
    %4 = vector.load %arg3[%c0_5, %c0_6] : memref<1x64xf32, #tpu.memory_space<vmem>>, vector<1x64xf32>
    %5 = vector.broadcast %4 : vector<1x64xf32> to vector<16x64xf32>
    %6 = arith.addf %3, %5 : vector<16x64xf32>
    %cst_7 = arith.constant 5.000000e-01 : f32
    %7 = vector.broadcast %cst_7 : f32 to vector<16x64xf32>
    %8 = arith.mulf %7, %6 : vector<16x64xf32>
    %cst_8 = arith.constant 0.707106769 : f32
    %9 = vector.broadcast %cst_8 : f32 to vector<16x64xf32>
    %10 = arith.mulf %6, %9 : vector<16x64xf32>
    %11 = math.absf %10 : vector<16x64xf32>
    %cst_9 = arith.constant 0.327591091 : f32
    %12 = vector.broadcast %cst_9 : f32 to vector<16x64xf32>
    %13 = arith.mulf %12, %11 : vector<16x64xf32>
    %cst_10 = arith.constant 1.000000e+00 : f32
    %14 = vector.broadcast %cst_10 : f32 to vector<16x64xf32>
    %15 = arith.addf %14, %13 : vector<16x64xf32>
    %cst_11 = arith.constant 1.000000e+00 : f32
    %16 = vector.broadcast %cst_11 : f32 to vector<16x64xf32>
    %17 = arith.divf %16, %15 : vector<16x64xf32>
    %cst_12 = arith.constant 1.06140542 : f32
    %18 = vector.broadcast %cst_12 : f32 to vector<16x64xf32>
    %19 = arith.mulf %18, %17 : vector<16x64xf32>
    %cst_13 = arith.constant -1.45315206 : f32
    %20 = vector.broadcast %cst_13 : f32 to vector<16x64xf32>
    %21 = arith.addf %19, %20 : vector<16x64xf32>
    %22 = arith.mulf %21, %17 : vector<16x64xf32>
    %cst_14 = arith.constant 1.42141378 : f32
    %23 = vector.broadcast %cst_14 : f32 to vector<16x64xf32>
    %24 = arith.addf %22, %23 : vector<16x64xf32>
    %25 = arith.mulf %24, %17 : vector<16x64xf32>
    %cst_15 = arith.constant -0.284496725 : f32
    %26 = vector.broadcast %cst_15 : f32 to vector<16x64xf32>
    %27 = arith.addf %25, %26 : vector<16x64xf32>
    %28 = arith.mulf %27, %17 : vector<16x64xf32>
    %cst_16 = arith.constant 0.254829586 : f32
    %29 = vector.broadcast %cst_16 : f32 to vector<16x64xf32>
    %30 = arith.addf %28, %29 : vector<16x64xf32>
    %31 = arith.mulf %30, %17 : vector<16x64xf32>
    %cst_17 = arith.constant 0.000000e+00 : f32
    %32 = vector.broadcast %cst_17 : f32 to vector<16x64xf32>
    %33 = arith.subf %32, %11 : vector<16x64xf32>
    %34 = arith.mulf %33, %11 : vector<16x64xf32>
    %35 = math.exp %34 : vector<16x64xf32>
    %36 = arith.mulf %31, %35 : vector<16x64xf32>
    %cst_18 = arith.constant 1.000000e+00 : f32
    %37 = vector.broadcast %cst_18 : f32 to vector<16x64xf32>
    %38 = arith.subf %37, %36 : vector<16x64xf32>
    %cst_19 = arith.constant 0.000000e+00 : f32
    %39 = vector.broadcast %cst_19 : f32 to vector<16x64xf32>
    %40 = arith.cmpf olt, %10, %39 : vector<16x64xf32>
    %cst_20 = arith.constant 0.000000e+00 : f32
    %41 = vector.broadcast %cst_20 : f32 to vector<16x64xf32>
    %42 = arith.subf %41, %38 : vector<16x64xf32>
    %43 = arith.select %40, %42, %38 : vector<16x64xi1>, vector<16x64xf32>
    %cst_21 = arith.constant 1.000000e+00 : f32
    %44 = vector.broadcast %cst_21 : f32 to vector<16x64xf32>
    %45 = arith.addf %44, %43 : vector<16x64xf32>
    %46 = arith.mulf %8, %45 : vector<16x64xf32>
    %cst_22 = arith.constant dense<0.000000e+00> : vector<16x128xf32>
    %47 = tpu.matmul %46, %1, %cst_22 {dimension_numbers = #tpu.dot_dimension_numbers<[1], [0], [0], [1], [0, 0, 1, 1], [], []>} : vector<16x64xf32>, vector<64x128xf32>, vector<16x128xf32> -> vector<16x128xf32>
    %c0_23 = arith.constant 0 : index
    %c0_24 = arith.constant 0 : index
    %48 = vector.load %arg5[%c0_23, %c0_24] : memref<1x128xf32, #tpu.memory_space<vmem>>, vector<1x128xf32>
    %49 = vector.broadcast %48 : vector<1x128xf32> to vector<16x128xf32>
    %50 = arith.addf %47, %49 : vector<16x128xf32>
    %cst_25 = arith.constant 5.000000e-01 : f32
    %51 = vector.broadcast %cst_25 : f32 to vector<16x128xf32>
    %52 = arith.mulf %51, %50 : vector<16x128xf32>
    %cst_26 = arith.constant 0.707106769 : f32
    %53 = vector.broadcast %cst_26 : f32 to vector<16x128xf32>
    %54 = arith.mulf %50, %53 : vector<16x128xf32>
    %55 = math.absf %54 : vector<16x128xf32>
    %cst_27 = arith.constant 0.327591091 : f32
    %56 = vector.broadcast %cst_27 : f32 to vector<16x128xf32>
    %57 = arith.mulf %56, %55 : vector<16x128xf32>
    %cst_28 = arith.constant 1.000000e+00 : f32
    %58 = vector.broadcast %cst_28 : f32 to vector<16x128xf32>
    %59 = arith.addf %58, %57 : vector<16x128xf32>
    %cst_29 = arith.constant 1.000000e+00 : f32
    %60 = vector.broadcast %cst_29 : f32 to vector<16x128xf32>
    %61 = arith.divf %60, %59 : vector<16x128xf32>
    %cst_30 = arith.constant 1.06140542 : f32
    %62 = vector.broadcast %cst_30 : f32 to vector<16x128xf32>
    %63 = arith.mulf %62, %61 : vector<16x128xf32>
    %cst_31 = arith.constant -1.45315206 : f32
    %64 = vector.broadcast %cst_31 : f32 to vector<16x128xf32>
    %65 = arith.addf %63, %64 : vector<16x128xf32>
    %66 = arith.mulf %65, %61 : vector<16x128xf32>
    %cst_32 = arith.constant 1.42141378 : f32
    %67 = vector.broadcast %cst_32 : f32 to vector<16x128xf32>
    %68 = arith.addf %66, %67 : vector<16x128xf32>
    %69 = arith.mulf %68, %61 : vector<16x128xf32>
    %cst_33 = arith.constant -0.284496725 : f32
    %70 = vector.broadcast %cst_33 : f32 to vector<16x128xf32>
    %71 = arith.addf %69, %70 : vector<16x128xf32>
    %72 = arith.mulf %71, %61 : vector<16x128xf32>
    %cst_34 = arith.constant 0.254829586 : f32
    %73 = vector.broadcast %cst_34 : f32 to vector<16x128xf32>
    %74 = arith.addf %72, %73 : vector<16x128xf32>
    %75 = arith.mulf %74, %61 : vector<16x128xf32>
    %cst_35 = arith.constant 0.000000e+00 : f32
    %76 = vector.broadcast %cst_35 : f32 to vector<16x128xf32>
    %77 = arith.subf %76, %55 : vector<16x128xf32>
    %78 = arith.mulf %77, %55 : vector<16x128xf32>
    %79 = math.exp %78 : vector<16x128xf32>
    %80 = arith.mulf %75, %79 : vector<16x128xf32>
    %cst_36 = arith.constant 1.000000e+00 : f32
    %81 = vector.broadcast %cst_36 : f32 to vector<16x128xf32>
    %82 = arith.subf %81, %80 : vector<16x128xf32>
    %cst_37 = arith.constant 0.000000e+00 : f32
    %83 = vector.broadcast %cst_37 : f32 to vector<16x128xf32>
    %84 = arith.cmpf olt, %54, %83 : vector<16x128xf32>
    %cst_38 = arith.constant 0.000000e+00 : f32
    %85 = vector.broadcast %cst_38 : f32 to vector<16x128xf32>
    %86 = arith.subf %85, %82 : vector<16x128xf32>
    %87 = arith.select %84, %86, %82 : vector<16x128xi1>, vector<16x128xf32>
    %cst_39 = arith.constant 1.000000e+00 : f32
    %88 = vector.broadcast %cst_39 : f32 to vector<16x128xf32>
    %89 = arith.addf %88, %87 : vector<16x128xf32>
    %90 = arith.mulf %52, %89 : vector<16x128xf32>
    %c0_40 = arith.constant 0 : index
    %c0_41 = arith.constant 0 : index
    %91 = vector.load %arg6[%c0_40, %c0_41] : memref<16x128xf32, #tpu.memory_space<vmem>>, vector<16x128xf32>
    tpu.vector_store %arg6[%c0_40, %c0_41], %90 {strides = array<i32>} : memref<16x128xf32, #tpu.memory_space<vmem>>, vector<16x128xf32>,
    return
  }
  func.func @transform_0(%arg0: i32) -> (i32, i32) {
    %c0_i32 = arith.constant 0 : i32
    %c0_i32_0 = arith.constant 0 : i32
    return %arg0, %c0_i32 : i32, i32
  }
  func.func @transform_1(%arg0: i32) -> (i32, i32) {
    %c0_i32 = arith.constant 0 : i32
    %c0_i32_0 = arith.constant 0 : i32
    %c0_i32_1 = arith.constant 0 : i32
    return %c0_i32, %c0_i32_0 : i32, i32
  }
  func.func @transform_2(%arg0: i32) -> (i32, i32) {
    %c0_i32 = arith.constant 0 : i32
    %c0_i32_0 = arith.constant 0 : i32
    %c0_i32_1 = arith.constant 0 : i32
    return %c0_i32, %c0_i32_0 : i32, i32
  }
  func.func @transform_3(%arg0: i32) -> (i32, i32) {
    %c0_i32 = arith.constant 0 : i32
    %c0_i32_0 = arith.constant 0 : i32
    %c0_i32_1 = arith.constant 0 : i32
    return %c0_i32, %c0_i32_0 : i32, i32
  }
  func.func @transform_4(%arg0: i32) -> (i32, i32) {
    %c0_i32 = arith.constant 0 : i32
    %c0_i32_0 = arith.constant 0 : i32
    %c0_i32_1 = arith.constant 0 : i32
    return %c0_i32, %c0_i32_0 : i32, i32
  }
  func.func @transform_5(%arg0: i32) -> (i32, i32) {
    %c0_i32 = arith.constant 0 : i32
    %c0_i32_0 = arith.constant 0 : i32
    return %arg0, %c0_i32 : i32, i32
  }
}

</mosaic_0001>

<bundles_post_ra>
// kernel: tpu_custom_call.1
= control target key start
LH: loop header
LB: loop body
LE: loop exit
PB: predicated region body
PF: predicated region fallthrough
CT: control target
= control target key end

     0   :  { %10 = vsyncpa [#allocation3], 0  ;;  %s572_s0 = inlined_call_operand.hbm [shape: f32[16,32], index: 0, kind: input, shape index: {}]   ;;  %s573_s1 = inlined_call_operand.hbm [shape: f32[32,64], index: 1, kind: input, shape index: {}]   ;;  %s574_s2 = inlined_call_operand.vmem [shape: f32[1,64], index: 2, kind: input, shape index: {}]   ;;  %s575_s3 = inlined_call_operand.hbm [shape: f32[64,128], index: 3, kind: input, shape index: {}]   ;;  %s576_s4 = inlined_call_operand.vmem [shape: f32[1,128], index: 4, kind: input, shape index: {}]   ;;  %s577_s5 = inlined_call_operand.hbm [shape: f32[16,128], index: 5, kind: output, shape index: {}]  }
   0x1   :  { %11 = vsyncpa [#allocation6], 0 }
   0x2   :  { %12 = vsyncpa [#allocation4], 0  ;;  %s30_s20 = sshll.u32 %s573_s1, 4  ;;  %s474_s21 = smov [#allocation5]   ;;  %s31_s20 = int_to_ptr.hbm [resolvable:$true] %s30_s20 }
   0x3   :  { %s32_s22 = sshll.u32 %s474_s21, 4  ;;  %s17_s25 = sshll.u32 %s572_s0, 4  ;;  %s33_s22 = int_to_ptr.vmem [resolvable:$true] %s32_s22  ;;  %s18_s25 = int_to_ptr.hbm [resolvable:$true] %s17_s25 }
   0x4   :  { %s475_s26 = smov 128   ;;  %s476_s27 = smov 8  }
   0x5   :  { %38 = dma.hbm_to_vmem [thread:$0]  %s31_s20, 512, %s33_s22, [#allocation6], %s475_s26, %s475_s26, %s476_s27  }
   0x6   :  { %s477_s28 = smov [#allocation2]   ;;  %s45_s1 = sshll.u32 %s575_s3, 4  ;;  %s46_s1 = int_to_ptr.hbm [resolvable:$true] %s45_s1 }
   0x7   :  { %s19_s29 = sshll.u32 %s477_s28, 4  ;;  %s478_s0 = smov [#allocation7]   ;;  %s20_s29 = int_to_ptr.vmem [resolvable:$true] %s19_s29 }
   0x8   :  { %25 = dma.hbm_to_vmem [thread:$0]  %s18_s25, 256, %s20_s29, [#allocation3], %s475_s26, %s475_s26, %s476_s27  }
   0x9   :  { %s47_s7 = sshll.u32 %s478_s0, 4  ;;  %s48_s7 = int_to_ptr.vmem [resolvable:$true] %s47_s7 }
   0xa   :  { %53 = dma.hbm_to_vmem [thread:$0]  %s46_s1, 1024, %s48_s7, [#allocation6], %s475_s26, %s475_s26, %s476_s27  }
   0xb   :  { %468 = dma.done.wait [#allocation3], 256  }
   0xc   :  { %469 = vsyncadd [#allocation3], 4294967040 }
   0xd   :  { %470 = dma.done.wait [#allocation6], 1536  }
   0xe   :  { %471 = vsyncadd [#allocation6], 4294965760  ;;  %v71_v0 = vld [vmem:[#allocation5 + $0x18] sm:$0xff]  ;;  %v70_v1 = vld [vmem:[#allocation5 + $0x10] sm:$0xff]  ;;  %vm86_vm0 = vcmask 261120   ;;  %vm200_vm10 = vcmask 523264  }
   0xf   :  { %105 = vmatpush.msra.mxu0 %v71_v0  ;;  %336 = vmatpush.msra.mxu3 %v71_v0  ;;  %v69_v2 = vld [vmem:[#allocation5 + $0x8] sm:$0xff]  ;;  %v68_v3 = vld [vmem:[#allocation5] sm:$0xff]  ;;  %v80_v4 = vld [vmem:[#allocation2] sm:$0xff]  ;;  %s318_s13 = sshll.u32 %s577_s5, 4  ;;  %s319_s13 = int_to_ptr.hbm [resolvable:$true] %s318_s13 }
  0x10   :  { %v81_v5 = vld [vmem:[#allocation2 + $0x8] sm:$0xff]  ;;  %v354_v6 = vld [vmem:[%s574_s2] ss:$0 sm:$0xff]  ;;  %v77_v9 = vld [vmem:[#allocation7 + $0x28] sm:$0xff] }
  0x11   :  { %106 = vmatpush.msra.mxu0 %v70_v1  ;;  %337 = vmatpush.msra.mxu3 %v70_v1  ;;  %v79_v7 = vld [vmem:[#allocation7 + $0x38] sm:$0xff]  ;;  %v78_v8 = vld [vmem:[#allocation7 + $0x30] sm:$0xff]  ;;  %v76_v12 = vld [vmem:[#allocation7 + $0x20] sm:$0xff] }
  0x12   :  { %215 = vmatpush.msra.mxu1 %v79_v7  ;;  %340 = vmatpush.msra.mxu2 %v79_v7  ;;  %v75_v14 = vld [vmem:[#allocation7 + $0x18] sm:$0xff]  ;;  %v74_v16 = vld [vmem:[#allocation7 + $0x10] sm:$0xff]  ;;  %v73_v20 = vld [vmem:[#allocation7 + $0x8] sm:$0xff] }
  0x13   :  { %107 = vmatpush.msra.mxu0 %v69_v2  ;;  %338 = vmatpush.msra.mxu3 %v69_v2  ;;  %v72_v23 = vld [vmem:[#allocation7] sm:$0xff] }
  0x14   :  { %216 = vmatpush.msra.mxu1 %v78_v8  ;;  %341 = vmatpush.msra.mxu2 %v78_v8 }
  0x15   :  { %108 = vmatpush.msra.mxu0 %v68_v3  ;;  %339 = vmatpush.msra.mxu3 %v68_v3 }
  0x16   :  { %332 = vmatmul.msk.f32.vlgmr.msra.gmra.mxu0 %vm86_vm0, %v80_v4  ;;  %333 = vmatmul.msk.f32.vlgmr.msra.gmra.mxu3 %vm86_vm0, %v81_v5 }
  0x17   :  { %217 = vmatpush.msra.mxu1 %v77_v9  ;;  %342 = vmatpush.msra.mxu2 %v77_v9 }
  0x19   :  { %218 = vmatpush.msra.mxu1 %v76_v12  ;;  %343 = vmatpush.msra.mxu2 %v76_v12 }
  0x1b   :  { %219 = vmatpush.msra.mxu1 %v75_v14  ;;  %344 = vmatpush.msra.mxu2 %v75_v14 }
  0x1d   :  { %220 = vmatpush.msra.mxu1 %v74_v16  ;;  %345 = vmatpush.msra.mxu2 %v74_v16 }
  0x1f   :  { %221 = vmatpush.msra.mxu1 %v73_v20  ;;  %346 = vmatpush.msra.mxu2 %v73_v20 }
  0x21   :  { %222 = vmatpush.msra.mxu1 %v72_v23  ;;  %347 = vmatpush.msra.mxu2 %v72_v23 }
  0x93   :  { %v110_v10 = vpop.f32.mrf.mxu0 }
  0x94   :  { %v531_v11 = vadd.f32 %v354_v6, %v110_v10 }
  0x96   :  { %v534_v13 = vmul.f32 0.70710677, %v531_v11 }
  0x98   :  { %v120_v15 = vand.u32 2147483647, %v534_v13  ;;  %vm186_vm9 = vcmp.lt.f32.partialorder %v534_v13, 0.0  ;;  %v355_v13 = vld [vmem:[%s576_s4] ss:$0 sm:$0xff]  ;;  %s479_s4 = smov [#allocation8]  }
  0x99   :  { %v113_v17 = vpop.f32.mrf.mxu3  ;;  %s316_s10 = sshll.u32 %s479_s4, 4  ;;  %s317_s10 = int_to_ptr.vmem [resolvable:$true] %s316_s10 }
  0x9a   :  { %v122_v18 = vmul.f32 0.3275911, %v120_v15  ;;  %v537_v19 = vadd.f32 %v354_v6, %v113_v17  ;;  %v174_v38 = vsub.f32 0.0, %v120_v15 }
  0x9c   :  { %v124_v21 = vadd.f32 1.0, %v122_v18  ;;  %v540_v22 = vmul.f32 0.70710677, %v537_v19  ;;  %v176_v46 = vmul.f32 %v174_v38, %v120_v15  ;;  %v116_v15 = vmul.f32 0.5, %v531_v11 }
  0x9e   :  { %356 = vrcp.f32 %v124_v21  ;;  %v121_v24 = vand.u32 2147483647, %v540_v22  ;;  %v137_v29 = vand.u32 2147483648, %v124_v21  ;;  %vm131_vm1 = vweird.f32 %v124_v21 }
  0x9f   :  { %v135_v31 = vand.u32 2147483647, %v124_v21  ;;  %v178_v54 = vmul.f32 1.442695, %v176_v46  ;;  %vm187_vm11 = vcmp.lt.f32.partialorder %v540_v22, 0.0 }
  0xa0   :  { %v123_v25 = vmul.f32 0.3275911, %v121_v24  ;;  %v138_v33 = vor.u32 1.1754944e-38, %v137_v29  ;;  %v175_v51 = vsub.f32 0.0, %v121_v24 }
  0xa1   :  { %vm136_vm4 = vcmp.eq.f32.partialorder %v135_v31, 8.507059e+37 }
  0xa2   :  { %v125_v26 = vadd.f32 1.0, %v123_v25  ;;  %v177_v58 = vmul.f32 %v175_v51, %v121_v24  ;;  %v117_v24 = vmul.f32 0.5, %v537_v19 }
  0xa4   :  { %v357_v27 = vpop.eup %356  ;;  %358 = vrcp.f32 %v125_v26  ;;  %v152_v41 = vand.u32 2147483648, %v125_v26  ;;  %v150_v44 = vand.u32 2147483647, %v125_v26  ;;  %vm146_vm6 = vweird.f32 %v125_v26 }
  0xa5   :  { %v127_v28 = vmul.f32 %v357_v27, %v124_v21  ;;  %vm132_vm2 = vweird.f32 %v357_v27  ;;  %360 = vpow2.f32 %v178_v54  ;;  %v180_v63 = vmul.f32 1.442695, %v177_v58 }
  0xa6   :  { %vm133_vm3 = vmor %vm131_vm1, %vm132_vm2  ;;  %v153_v48 = vor.u32 1.1754944e-38, %v152_v41  ;;  %vm151_vm8 = vcmp.eq.f32.partialorder %v150_v44, 8.507059e+37 }
  0xa7   :  { %v128_v30 = vsub.f32 1.0, %v127_v28  ;;  %362 = vpow2.f32 %v180_v63 }
  0xa9   :  { %v129_v32 = vmul.f32 %v357_v27, %v128_v30 }
  0xaa   :  { %v359_v34 = vpop.eup %358 }
  0xab   :  { %v130_v35 = vadd.f32 %v357_v27, %v129_v32  ;;  %v142_v36 = vmul.f32 %v359_v34, %v125_v26  ;;  %vm147_vm5 = vweird.f32 %v359_v34  ;;  %v361_v3 = vpop.eup %360 }
  0xac   :  { %vm148_vm7 = vmor %vm146_vm6, %vm147_vm5 }
  0xad   :  { %v134_v37 = vsel %vm133_vm3, %v357_v27, %v130_v35  ;;  %v143_v39 = vsub.f32 1.0, %v142_v36  ;;  %v363_v12 = vpop.eup %362 }
  0xae   :  { %v139_v40 = vsel %vm136_vm4, %v138_v33, %v134_v37 }
  0xaf   :  { %v156_v42 = vmul.f32 1.0614054, %v139_v40  ;;  %v144_v43 = vmul.f32 %v359_v34, %v143_v39 }
  0xb1   :  { %v158_v45 = vadd.f32 -1.4531521, %v156_v42  ;;  %v145_v47 = vadd.f32 %v359_v34, %v144_v43 }
  0xb3   :  { %v160_v49 = vmul.f32 %v158_v45, %v139_v40  ;;  %v149_v50 = vsel %vm148_vm7, %v359_v34, %v145_v47 }
  0xb4   :  { %v154_v53 = vsel %vm151_vm8, %v153_v48, %v149_v50 }
  0xb5   :  { %v162_v52 = vadd.f32 1.4214138, %v160_v49  ;;  %v157_v55 = vmul.f32 1.0614054, %v154_v53 }
  0xb7   :  { %v164_v56 = vmul.f32 %v162_v52, %v139_v40  ;;  %v159_v57 = vadd.f32 -1.4531521, %v157_v55 }
  0xb9   :  { %v166_v59 = vadd.f32 -0.28449672, %v164_v56  ;;  %v161_v60 = vmul.f32 %v159_v57, %v154_v53 }
  0xbb   :  { %v168_v61 = vmul.f32 %v166_v59, %v139_v40  ;;  %v163_v62 = vadd.f32 1.4214138, %v161_v60 }
  0xbd   :  { %v170_v0 = vadd.f32 0.2548296, %v168_v61  ;;  %v165_v1 = vmul.f32 %v163_v62, %v154_v53 }
  0xbf   :  { %v172_v2 = vmul.f32 %v170_v0, %v139_v40  ;;  %v167_v4 = vadd.f32 -0.28449672, %v165_v1 }
  0xc1   :  { %v182_v5 = vmul.f32 %v361_v3, %v172_v2  ;;  %v169_v6 = vmul.f32 %v167_v4, %v154_v53 }
  0xc3   :  { %v184_v7 = vsub.f32 1.0, %v182_v5  ;;  %v171_v8 = vadd.f32 0.2548296, %v169_v6 }
  0xc5   :  { %v188_v9 = vsub.f32 0.0, %v184_v7  ;;  %v173_v10 = vmul.f32 %v171_v8, %v154_v53 }
  0xc7   :  { %v190_v14 = vsel %vm186_vm9, %v188_v9, %v184_v7  ;;  %v183_v17 = vmul.f32 %v363_v12, %v173_v10 }
  0xc8   :  { %v192_v16 = vadd.f32 1.0, %v190_v14 }
  0xc9   :  { %v185_v20 = vsub.f32 1.0, %v183_v17 }
  0xca   :  { %v194_v18 = vmul.f32 %v192_v16, %v116_v15 }
  0xcb   :  { %v189_v21 = vsub.f32 0.0, %v185_v20 }
  0xcc   :  { %334 = vmatmul.msk.f32.vlgmr.msra.gmra.mxu1 %vm200_vm10, %v194_v18 }
  0xcd   :  { %v191_v23 = vsel %vm187_vm11, %v189_v21, %v185_v20 }
  0xce   :  { %v193_v25 = vadd.f32 1.0, %v191_v23 }
  0xd0   :  { %v195_v26 = vmul.f32 %v193_v25, %v117_v24 }
  0xd2   :  { %335 = vmatmul.msk.f32.vlgmr.msra.gmra.mxu2 %vm200_vm10, %v195_v26 }
 0x149   :  { %v224_v11 = vpop.f32.mrf.mxu1 }
 0x14a   :  { %v550_v27 = vadd.f32 %v355_v13, %v224_v11 }
 0x14c   :  { %v553_v28 = vmul.f32 0.70710677, %v550_v27  ;;  %v230_v21 = vmul.f32 0.5, %v550_v27 }
 0x14e   :  { %v234_v29 = vand.u32 2147483647, %v553_v28  ;;  %vm300_vm4 = vcmp.lt.f32.partialorder %v553_v28, 0.0 }
 0x150   :  { %v236_v30 = vmul.f32 0.3275911, %v234_v29  ;;  %v288_v46 = vsub.f32 0.0, %v234_v29 }
 0x152   :  { %v238_v22 = vadd.f32 1.0, %v236_v30  ;;  %v290_v50 = vmul.f32 %v288_v46, %v234_v29 }
 0x154   :  { %364 = vrcp.f32 %v238_v22  ;;  %v251_v38 = vand.u32 2147483648, %v238_v22  ;;  %v249_v40 = vand.u32 2147483647, %v238_v22  ;;  %vm245_vm13 = vweird.f32 %v238_v22 }
 0x155   :  { %v227_v31 = vpop.f32.mrf.mxu2  ;;  %v292_v56 = vmul.f32 1.442695, %v290_v50 }
 0x156   :  { %v556_v19 = vadd.f32 %v355_v13, %v227_v31  ;;  %v252_v43 = vor.u32 1.1754944e-38, %v251_v38  ;;  %vm250_vm15 = vcmp.eq.f32.partialorder %v249_v40, 8.507059e+37 }
 0x158   :  { %v559_v32 = vmul.f32 0.70710677, %v556_v19  ;;  %v231_v27 = vmul.f32 0.5, %v556_v19 }
 0x15a   :  { %v365_v33 = vpop.eup %364  ;;  %v235_v35 = vand.u32 2147483647, %v559_v32  ;;  %vm301_vm5 = vcmp.lt.f32.partialorder %v559_v32, 0.0 }
 0x15b   :  { %v241_v34 = vmul.f32 %v365_v33, %v238_v22  ;;  %vm246_vm12 = vweird.f32 %v365_v33 }
 0x15c   :  { %v237_v37 = vmul.f32 0.3275911, %v235_v35  ;;  %vm247_vm14 = vmor %vm245_vm13, %vm246_vm12  ;;  %v289_v2 = vsub.f32 0.0, %v235_v35 }
 0x15d   :  { %v242_v36 = vsub.f32 1.0, %v241_v34 }
 0x15e   :  { %v239_v41 = vadd.f32 1.0, %v237_v37  ;;  %v291_v7 = vmul.f32 %v289_v2, %v235_v35 }
 0x15f   :  { %v243_v39 = vmul.f32 %v365_v33, %v242_v36 }
 0x160   :  { %366 = vrcp.f32 %v239_v41  ;;  %v266_v55 = vand.u32 2147483648, %v239_v41  ;;  %v264_v58 = vand.u32 2147483647, %v239_v41  ;;  %vm260_vm1 = vweird.f32 %v239_v41 }
 0x161   :  { %v244_v42 = vadd.f32 %v365_v33, %v243_v39  ;;  %368 = vpow2.f32 %v292_v56  ;;  %v294_v15 = vmul.f32 1.442695, %v291_v7 }
 0x162   :  { %v267_v62 = vor.u32 1.1754944e-38, %v266_v55  ;;  %vm265_vm3 = vcmp.eq.f32.partialorder %v264_v58, 8.507059e+37 }
 0x163   :  { %v248_v44 = vsel %vm247_vm14, %v365_v33, %v244_v42  ;;  %370 = vpow2.f32 %v294_v15 }
 0x164   :  { %v253_v45 = vsel %vm250_vm15, %v252_v43, %v248_v44 }
 0x165   :  { %v270_v47 = vmul.f32 1.0614054, %v253_v45 }
 0x166   :  { %v367_v48 = vpop.eup %366 }
 0x167   :  { %v272_v49 = vadd.f32 -1.4531521, %v270_v47  ;;  %v256_v51 = vmul.f32 %v367_v48, %v239_v41  ;;  %vm261_vm0 = vweird.f32 %v367_v48  ;;  %v369_v8 = vpop.eup %368 }
 0x168   :  { %vm262_vm2 = vmor %vm260_vm1, %vm261_vm0 }
 0x169   :  { %v274_v52 = vmul.f32 %v272_v49, %v253_v45  ;;  %v257_v53 = vsub.f32 1.0, %v256_v51  ;;  %v371_v11 = vpop.eup %370 }
 0x16b   :  { %v276_v54 = vadd.f32 1.4214138, %v274_v52  ;;  %v258_v57 = vmul.f32 %v367_v48, %v257_v53 }
 0x16d   :  { %v278_v59 = vmul.f32 %v276_v54, %v253_v45  ;;  %v259_v60 = vadd.f32 %v367_v48, %v258_v57 }
 0x16f   :  { %v280_v61 = vadd.f32 -0.28449672, %v278_v59  ;;  %v263_v63 = vsel %vm262_vm2, %v367_v48, %v259_v60 }
 0x170   :  { %v268_v1 = vsel %vm265_vm3, %v267_v62, %v263_v63 }
 0x171   :  { %v282_v0 = vmul.f32 %v280_v61, %v253_v45  ;;  %v271_v3 = vmul.f32 1.0614054, %v268_v1 }
 0x173   :  { %v284_v4 = vadd.f32 0.2548296, %v282_v0  ;;  %v273_v5 = vadd.f32 -1.4531521, %v271_v3 }
 0x175   :  { %v286_v6 = vmul.f32 %v284_v4, %v253_v45  ;;  %v275_v9 = vmul.f32 %v273_v5, %v268_v1 }
 0x177   :  { %v296_v10 = vmul.f32 %v369_v8, %v286_v6  ;;  %v277_v12 = vadd.f32 1.4214138, %v275_v9 }
 0x179   :  { %v298_v14 = vsub.f32 1.0, %v296_v10  ;;  %v279_v16 = vmul.f32 %v277_v12, %v268_v1 }
 0x17b   :  { %v302_v17 = vsub.f32 0.0, %v298_v14  ;;  %v281_v18 = vadd.f32 -0.28449672, %v279_v16 }
 0x17d   :  { %v304_v20 = vsel %vm300_vm4, %v302_v17, %v298_v14  ;;  %v283_v24 = vmul.f32 %v281_v18, %v268_v1 }
 0x17e   :  { %v306_v23 = vadd.f32 1.0, %v304_v20 }
 0x17f   :  { %v285_v26 = vadd.f32 0.2548296, %v283_v24 }
 0x180   :  { %v308_v25 = vmul.f32 %v306_v23, %v230_v21 }
 0x181   :  { %v287_v13 = vmul.f32 %v285_v26, %v268_v1 }
 0x182   :  { %310 = vst [vmem:[#allocation8] sm:$0xff] %v308_v25 }
 0x183   :  { %v297_v29 = vmul.f32 %v371_v11, %v287_v13 }
 0x185   :  { %v299_v30 = vsub.f32 1.0, %v297_v29 }
 0x187   :  { %v303_v22 = vsub.f32 0.0, %v299_v30 }
 0x189   :  { %v305_v31 = vsel %vm301_vm5, %v303_v22, %v299_v30 }
 0x18a   :  { %v307_v28 = vadd.f32 1.0, %v305_v31 }
 0x18c   :  { %v309_v33 = vmul.f32 %v307_v28, %v231_v27 }
 0x18e   :  { %311 = vst [vmem:[#allocation8 + $0x8] sm:$0xff] %v309_v33 }
 0x18f   :  { %324 = dma.vmem_to_hbm [thread:$0]  %s317_s10, 256, %s319_s13, [#allocation4], %s475_s26, %s475_s26, %s476_s27  }
 0x190   :  { %472 = dma.done.wait [#allocation4], 256  }
 0x191   :  { %473 = vsyncadd [#allocation4], 4294967040 }
 0x192   :  { %329 = vsyncpa [#allocation3], 1 }
 0x193   :  { %330 = vsyncpa [#allocation6], 1 }
 0x194   :  { %331 = vsyncpa [#allocation4], 1 }

</bundles_post_ra>
